<compile_context>
chip_gen: v7x
topology: tpu7x:2x2x1
jax: 0.10.0
libtpu: 0.0.40
codegen_flags: <defaults>
</compile_context>

<pallas_src>
import functools

import jax
import jax.numpy as jnp
from jax.experimental import pallas as pl
from jax.experimental.pallas import tpu as pltpu


HIDDEN = 64   # hidden width of both Linear layers in QNetwork.net
PACK = 2      # batch rows packed per kernel row  ->  2 * 64 = 128 dense lanes


def _round_up(x, m):
    return ((x + m - 1) // m) * m


def _block_diag2(w):
    """[[w, 0], [0, w]] — lets one matmul process two packed batch rows at once."""
    z = jnp.zeros_like(w)
    top = jnp.concatenate([w, z], axis=1)
    bot = jnp.concatenate([z, w], axis=1)
    return jnp.concatenate([top, bot], axis=0)


def _qnet_kernel(sp_ref, ap_ref, w1s_ref, w1a_ref, b1_ref, w2_ref, b2_ref, out_ref,
                 *, mxu_dtype):
    """relu(relu([s|a] @ W1 + b1) @ W2 + b2) on one packed (tile_p, 128) slab.

    Two batch rows are packed per row and weights are block-diagonal, so every
    intermediate and the output are 128 lanes wide (unmasked stores).  MXU
    accumulation and bias/ReLU math are float32 regardless of the I/O dtype.
    """
    def mx(x):
        return x if mxu_dtype is None else x.astype(mxu_dtype)

    # Layer 1: the concat is fused as two accumulating MXU dots.
    h1 = jnp.dot(mx(sp_ref[...]), mx(w1s_ref[...]), preferred_element_type=jnp.float32)
    h1 = h1 + jnp.dot(mx(ap_ref[...]), mx(w1a_ref[...]),
                      preferred_element_type=jnp.float32)
    h1 = jnp.maximum(h1 + b1_ref[...], 0.0)
    # Layer 2.
    w2 = mx(w2_ref[...])
    h2 = jnp.dot(h1.astype(w2.dtype), w2, preferred_element_type=jnp.float32)
    h2 = jnp.maximum(h2 + b2_ref[...], 0.0)
    out_ref[...] = h2.astype(out_ref.dtype)


def prepare_params(params, state_dim, *, io_dtype=jnp.float32):
    """Host-side weight prep, hoisted out of the per-call path (once per param update).

    PyTorch weights are (out, in); `params` stores the transpose (in, out) so the
    kernel computes x @ W + b.  W1 is split by feature group (fused concat) and all
    weights are put in block-diagonal diag(W, W) form for the 2-rows-per-row packing.
    """
    io_dtype = jnp.dtype(io_dtype)
    w1, b1, w2, b2 = params["w1"], params["b1"], params["w2"], params["b2"]
    d_in, hidden = w1.shape
    return {
        "state_dim": int(state_dim),
        "action_dim": int(d_in - state_dim),
        "hidden": int(hidden),
        "io_dtype": io_dtype,
        "w1s": _block_diag2(w1[:state_dim]).astype(io_dtype),             # (2*sd, 128)
        "w1a": _block_diag2(w1[state_dim:]).astype(io_dtype),             # (2*ad, 128)
        "w2":  _block_diag2(w2).astype(io_dtype),                         # (128, 128)
        "b1":  jnp.concatenate([b1, b1], axis=1).astype(jnp.float32),     # (1, 128)
        "b2":  jnp.concatenate([b2, b2], axis=1).astype(jnp.float32),     # (1, 128)
    }


def _choose_tile_b(b_pad, tb_mult, tile_b):
    """Batch rows per grid step (always a multiple of tb_mult)."""
    if tile_b is None:
        # ~8 grid steps for huge batches with 512-4096-row tiles; the double-buffered
        # working set stays ~1-4 MiB, far under even v7x's 64 MiB VMEM.
        tile_b = min(4096, max(512, _round_up(pl.cdiv(b_pad, 8), tb_mult)))
    tile_b = _round_up(max(int(tile_b), tb_mult), tb_mult)
    tile_b = min(tile_b, _round_up(b_pad, tb_mult))
    # Guarantee >= 2 grid steps whenever the batch allows it: needed for v7x's two
    # TensorCores (parallel grid axis) and for any DMA/compute overlap at all.
    if b_pad >= 2 * tb_mult:
        tile_b = min(tile_b, _round_up(b_pad // 2, tb_mult))
    return tile_b


def qnetwork_forward(state, action, prepared, *, out_dtype=None, mxu_dtype=None,
                     tile_b=None):
    """state: (B, state_dim), action: (B, action_dim)  ->  (B, 64).

    prepared : output of prepare_params() (weights already block-diagonalised / cast).
    out_dtype: dtype of the HBM output stream (~2/3 of total bytes); None -> the
               prepared io_dtype.  bf16 roughly halves output traffic on this
               bandwidth-bound kernel; accumulation stays float32 either way.
    mxu_dtype: force the matmul operand dtype inside the kernel (bfloat16 recommended
               on v5e, whose f32 MXU path is multi-pass) without changing the I/O.
    tile_b   : batch rows per grid step; None -> auto (>=2 steps, 512-4096-row tiles).
    """
    io_dtype = jnp.dtype(prepared["io_dtype"])
    out_dtype = io_dtype if out_dtype is None else jnp.dtype(out_dtype)
    mxu_dtype = None if mxu_dtype is None else jnp.dtype(mxu_dtype)

    B, sd = state.shape
    _, ad = action.shape
    assert sd == prepared["state_dim"] and ad == prepared["action_dim"]
    hidden = prepared["hidden"]
    packed_w = PACK * hidden                      # 128 lanes

    # Sublane minimums: f32 blocks need rows % 8 == 0, 16-bit blocks need % 16 == 0.
    sub = 8 if min(io_dtype.itemsize, out_dtype.itemsize) >= 4 else 16
    tb_mult = PACK * sub                          # 16 (all-f32) or 32 (any bf16 block)

    # Minimal padding only (never up to a tile_b multiple): avoids rewriting the whole
    # input arrays for ragged batches.  Ragged final grid blocks are masked by Pallas
    # (safe here: no cross-row reduction; padded rows are sliced off at the end).
    b_pad = _round_up(B, tb_mult)
    p_rows = b_pad // PACK
    tile_b = _choose_tile_b(b_pad, tb_mult, tile_b)
    tile_p = tile_b // PACK
    grid = (pl.cdiv(p_rows, tile_p),)

    def pack_rows(x, d):
        x = x.astype(io_dtype)
        if b_pad != B:
            x = jnp.pad(x, ((0, b_pad - B), (0, 0)))
        return x.reshape(p_rows, PACK * d)        # free row-major reshape

    state_p = pack_rows(state, sd)                # (p_rows, 2*sd)
    action_p = pack_rows(action, ad)              # (p_rows, 2*ad)

    operands = (state_p, action_p, prepared["w1s"], prepared["w1a"], prepared["b1"],
                prepared["w2"], prepared["b2"])
    bytes_accessed = sum(int(x.size) * x.dtype.itemsize for x in operands)
    bytes_accessed += p_rows * packed_w * out_dtype.itemsize          # output stream
    flops = 2 * p_rows * (PACK * sd + PACK * ad + packed_w) * packed_w
    cost = pl.CostEstimate(flops=int(flops), transcendentals=0,
                           bytes_accessed=int(bytes_accessed))

    out_packed = pl.pallas_call(
        functools.partial(_qnet_kernel, mxu_dtype=mxu_dtype),
        out_shape=jax.ShapeDtypeStruct((p_rows, packed_w), out_dtype),
        grid_spec=pltpu.PrefetchScalarGridSpec(
            num_scalar_prefetch=0,
            grid=grid,
            in_specs=[
                # batch-tiled activations (double-buffered by the pipeline)
                pl.BlockSpec((tile_p, PACK * sd), lambda i: (i, 0)),
                pl.BlockSpec((tile_p, PACK * ad), lambda i: (i, 0)),
                # weights/biases: constant index_map -> fetched once, VMEM-resident
                pl.BlockSpec((PACK * sd, packed_w), lambda i: (0, 0)),
                pl.BlockSpec((PACK * ad, packed_w), lambda i: (0, 0)),
                pl.BlockSpec((1, packed_w), lambda i: (0, 0)),
                pl.BlockSpec((packed_w, packed_w), lambda i: (0, 0)),
                pl.BlockSpec((1, packed_w), lambda i: (0, 0)),
            ],
            out_specs=pl.BlockSpec((tile_p, packed_w), lambda i: (i, 0)),
        ),
        compiler_params=pltpu.CompilerParams(
            # Independent batch tiles -> shard across the 2 TensorCores on v7x.
            dimension_semantics=("parallel",),
        ),
        cost_estimate=cost,
    )(*operands)

    # Free row-major unpack back to (B, hidden).
    return out_packed.reshape(b_pad, hidden)[:B]


def init_params(key, state_dim, action_dim, hidden=HIDDEN):
    """Xavier-uniform-style init matching the module's shapes (stored as (in, out))."""
    def xavier(k, fan_in, fan_out):
        limit = (6.0 / (fan_in + fan_out)) ** 0.5
        return jax.random.uniform(k, (fan_in, fan_out), jnp.float32, -limit, limit)

    k1, k2, k3 = jax.random.split(key, 3)
    d_in = state_dim + action_dim
    return {
        "w1": xavier(k1, d_in, hidden),
        "b1": jnp.zeros((1, hidden), jnp.float32),
        "w2": xavier(k2, hidden, hidden),
        "b2": jnp.zeros((1, hidden), jnp.float32),
        # v_val exists in __init__ but is unused by forward(); kept for fidelity.
        "w_v": xavier(k3, hidden, 1),
        "b_v": jnp.zeros((1, 1), jnp.float32),
    }


def reference_forward(state, action, params):
    sa = jnp.concatenate([state, action], axis=-1)
    h1 = jnp.maximum(sa @ params["w1"] + params["b1"], 0.0)
    return jnp.maximum(h1 @ params["w2"] + params["b2"], 0.0)


if __name__ == "__main__":
    key = jax.random.PRNGKey(0)
    kp, ks, ka, ks2, ka2 = jax.random.split(key, 5)

    # Small primary shapes: B=8, state_dim=24, action_dim=8  (d_in = 32).
    B, state_dim, action_dim = 8, 24, 8
    params = init_params(kp, state_dim, action_dim)
    state = jax.random.normal(ks, (B, state_dim), jnp.float32)
    action = jax.random.normal(ka, (B, action_dim), jnp.float32)
    ref = reference_forward(state, action, params)

    # Weight prep hoisted out of the forward path (review item): once per update.
    prep_f32 = prepare_params(params, state_dim)
    prep_bf16 = prepare_params(params, state_dim, io_dtype=jnp.bfloat16)

    # 1) float32 everywhere (matches the module's numerics).
    out = jax.block_until_ready(qnetwork_forward(state, action, prep_f32))
    assert out.shape == (B, HIDDEN)
    assert jnp.allclose(out, ref, atol=1e-4, rtol=1e-4)

    # 2) f32 compute, bf16 output stream (the dominant HBM traffic).
    out_bo = jax.block_until_ready(
        qnetwork_forward(state, action, prep_f32, out_dtype=jnp.bfloat16))
    assert out_bo.dtype == jnp.bfloat16 and out_bo.shape == (B, HIDDEN)
    assert jnp.allclose(out_bo.astype(jnp.float32), ref, atol=5e-2, rtol=5e-2)

    # 3) f32 I/O with bf16 MXU operands (v5e recommendation).
    out_mx = jax.block_until_ready(
        qnetwork_forward(state, action, prep_f32, mxu_dtype=jnp.bfloat16))
    assert jnp.allclose(out_mx, ref, atol=1e-1, rtol=1e-1)

    # 4) full bf16 I/O path.
    out_bf = jax.block_until_ready(qnetwork_forward(state, action, prep_bf16))
    assert out_bf.shape == (B, HIDDEN)
    assert jnp.allclose(out_bf.astype(jnp.float32), ref, atol=1e-1, rtol=1e-1)

    # 5) multi-tile + ragged batch (B not a multiple of 16 or tile_b), f32,
    #    minimal padding + cdiv grid with a masked final block.
    B2 = 300
    state2 = jax.random.normal(ks2, (B2, state_dim), jnp.float32)
    action2 = jax.random.normal(ka2, (B2, action_dim), jnp.float32)
    ref2 = reference_forward(state2, action2, params)
    out2 = jax.block_until_ready(
        qnetwork_forward(state2, action2, prep_f32, tile_b=64))
    assert out2.shape == (B2, HIDDEN)
    assert jnp.allclose(out2, ref2, atol=1e-4, rtol=1e-4)

    # 6) multi-tile ragged batch in bf16 (tile rounds to 32-row multiples; ragged
    #    final block exercised).
    out2b = jax.block_until_ready(
        qnetwork_forward(state2, action2, prep_bf16, tile_b=96))
    assert out2b.shape == (B2, HIDDEN)
    assert jnp.allclose(out2b.astype(jnp.float32), ref2, atol=1e-1, rtol=1e-1)

    print("KERNEL_OK")
</pallas_src>

<mosaic_0001>
module attributes {stable_mosaic.version = 11 : i64} {
  func.func @_qnet_kernel(%arg0: i32, %arg1: memref<8x48xf32, #tpu.memory_space<vmem>>, %arg2: memref<8x16xf32, #tpu.memory_space<vmem>>, %arg3: memref<48x128xf32, #tpu.memory_space<vmem>>, %arg4: memref<16x128xf32, #tpu.memory_space<vmem>>, %arg5: memref<1x128xf32, #tpu.memory_space<vmem>>, %arg6: memref<128x128xf32, #tpu.memory_space<vmem>>, %arg7: memref<1x128xf32, #tpu.memory_space<vmem>>, %arg8: memref<8x128xf32, #tpu.memory_space<vmem>>) attributes {dimension_semantics = [#tpu.dimension_semantics<parallel>], iteration_bounds = array<i64: 1>, scalar_prefetch = 0 : i64, scratch_operands = 0 : i64, tpu.core_type = #tpu.core_type<tc>, window_params = [{transform_indices = @transform_0, window_bounds = array<i64: 8, 48>}, {transform_indices = @transform_1, window_bounds = array<i64: 8, 16>}, {pipeline_mode = #tpu.pipeline_mode<synchronous>, transform_indices = @transform_2, window_bounds = array<i64: 48, 128>}, {pipeline_mode = #tpu.pipeline_mode<synchronous>, transform_indices = @transform_3, window_bounds = array<i64: 16, 128>}, {pipeline_mode = #tpu.pipeline_mode<synchronous>, transform_indices = @transform_4, window_bounds = array<i64: 1, 128>}, {pipeline_mode = #tpu.pipeline_mode<synchronous>, transform_indices = @transform_5, window_bounds = array<i64: 128, 128>}, {pipeline_mode = #tpu.pipeline_mode<synchronous>, transform_indices = @transform_6, window_bounds = array<i64: 1, 128>}, {transform_indices = @transform_7, window_bounds = array<i64: 8, 128>}]} {
    %c0 = arith.constant 0 : index
    %c0_0 = arith.constant 0 : index
    %0 = vector.load %arg1[%c0, %c0_0] : memref<8x48xf32, #tpu.memory_space<vmem>>, vector<8x48xf32>
    %c0_1 = arith.constant 0 : index
    %c0_2 = arith.constant 0 : index
    %1 = vector.load %arg3[%c0_1, %c0_2] : memref<48x128xf32, #tpu.memory_space<vmem>>, vector<48x128xf32>
    %cst = arith.constant dense<0.000000e+00> : vector<8x128xf32>
    %2 = tpu.matmul %0, %1, %cst {dimension_numbers = #tpu.dot_dimension_numbers<[1], [0], [0], [1], [0, 0, 1, 1], [], []>} : vector<8x48xf32>, vector<48x128xf32>, vector<8x128xf32> -> vector<8x128xf32>
    %c0_3 = arith.constant 0 : index
    %c0_4 = arith.constant 0 : index
    %3 = vector.load %arg2[%c0_3, %c0_4] : memref<8x16xf32, #tpu.memory_space<vmem>>, vector<8x16xf32>
    %c0_5 = arith.constant 0 : index
    %c0_6 = arith.constant 0 : index
    %4 = vector.load %arg4[%c0_5, %c0_6] : memref<16x128xf32, #tpu.memory_space<vmem>>, vector<16x128xf32>
    %cst_7 = arith.constant dense<0.000000e+00> : vector<8x128xf32>
    %5 = tpu.matmul %3, %4, %cst_7 {dimension_numbers = #tpu.dot_dimension_numbers<[1], [0], [0], [1], [0, 0, 1, 1], [], []>} : vector<8x16xf32>, vector<16x128xf32>, vector<8x128xf32> -> vector<8x128xf32>
    %6 = arith.addf %2, %5 : vector<8x128xf32>
    %c0_8 = arith.constant 0 : index
    %c0_9 = arith.constant 0 : index
    %7 = vector.load %arg5[%c0_8, %c0_9] : memref<1x128xf32, #tpu.memory_space<vmem>>, vector<1x128xf32>
    %8 = vector.broadcast %7 : vector<1x128xf32> to vector<8x128xf32>
    %9 = arith.addf %6, %8 : vector<8x128xf32>
    %cst_10 = arith.constant 0.000000e+00 : f32
    %10 = vector.broadcast %cst_10 : f32 to vector<8x128xf32>
    %11 = arith.maximumf %9, %10 : vector<8x128xf32>
    %c0_11 = arith.constant 0 : index
    %c0_12 = arith.constant 0 : index
    %12 = vector.load %arg6[%c0_11, %c0_12] : memref<128x128xf32, #tpu.memory_space<vmem>>, vector<128x128xf32>
    %cst_13 = arith.constant dense<0.000000e+00> : vector<8x128xf32>
    %13 = tpu.matmul %11, %12, %cst_13 {dimension_numbers = #tpu.dot_dimension_numbers<[1], [0], [0], [1], [0, 0, 1, 1], [], []>} : vector<8x128xf32>, vector<128x128xf32>, vector<8x128xf32> -> vector<8x128xf32>
    %c0_14 = arith.constant 0 : index
    %c0_15 = arith.constant 0 : index
    %14 = vector.load %arg7[%c0_14, %c0_15] : memref<1x128xf32, #tpu.memory_space<vmem>>, vector<1x128xf32>
    %15 = vector.broadcast %14 : vector<1x128xf32> to vector<8x128xf32>
    %16 = arith.addf %13, %15 : vector<8x128xf32>
    %cst_16 = arith.constant 0.000000e+00 : f32
    %17 = vector.broadcast %cst_16 : f32 to vector<8x128xf32>
    %18 = arith.maximumf %16, %17 : vector<8x128xf32>
    %c0_17 = arith.constant 0 : index
    %c0_18 = arith.constant 0 : index
    %19 = vector.load %arg8[%c0_17, %c0_18] : memref<8x128xf32, #tpu.memory_space<vmem>>, vector<8x128xf32>
    tpu.vector_store %arg8[%c0_17, %c0_18], %18 {strides = array<i32>} : memref<8x128xf32, #tpu.memory_space<vmem>>, vector<8x128xf32>,
    return
  }
  func.func @transform_0(%arg0: i32) -> (i32, i32) {
    %c0_i32 = arith.constant 0 : i32
    %c0_i32_0 = arith.constant 0 : i32
    return %arg0, %c0_i32 : i32, i32
  }
  func.func @transform_1(%arg0: i32) -> (i32, i32) {
    %c0_i32 = arith.constant 0 : i32
    %c0_i32_0 = arith.constant 0 : i32
    return %arg0, %c0_i32 : i32, i32
  }
  func.func @transform_2(%arg0: i32) -> (i32, i32) {
    %c0_i32 = arith.constant 0 : i32
    %c0_i32_0 = arith.constant 0 : i32
    %c0_i32_1 = arith.constant 0 : i32
    return %c0_i32, %c0_i32_0 : i32, i32
  }
  func.func @transform_3(%arg0: i32) -> (i32, i32) {
    %c0_i32 = arith.constant 0 : i32
    %c0_i32_0 = arith.constant 0 : i32
    %c0_i32_1 = arith.constant 0 : i32
    return %c0_i32, %c0_i32_0 : i32, i32
  }
  func.func @transform_4(%arg0: i32) -> (i32, i32) {
    %c0_i32 = arith.constant 0 : i32
    %c0_i32_0 = arith.constant 0 : i32
    %c0_i32_1 = arith.constant 0 : i32
    return %c0_i32, %c0_i32_0 : i32, i32
  }
  func.func @transform_5(%arg0: i32) -> (i32, i32) {
    %c0_i32 = arith.constant 0 : i32
    %c0_i32_0 = arith.constant 0 : i32
    %c0_i32_1 = arith.constant 0 : i32
    return %c0_i32, %c0_i32_0 : i32, i32
  }
  func.func @transform_6(%arg0: i32) -> (i32, i32) {
    %c0_i32 = arith.constant 0 : i32
    %c0_i32_0 = arith.constant 0 : i32
    %c0_i32_1 = arith.constant 0 : i32
    return %c0_i32, %c0_i32_0 : i32, i32
  }
  func.func @transform_7(%arg0: i32) -> (i32, i32) {
    %c0_i32 = arith.constant 0 : i32
    %c0_i32_0 = arith.constant 0 : i32
    return %arg0, %c0_i32 : i32, i32
  }
}

</mosaic_0001>

<bundles_post_ra>
// kernel: tpu_custom_call.1
= control target key start
LH: loop header
LB: loop body
LE: loop exit
PB: predicated region body
PF: predicated region fallthrough
CT: control target
= control target key end

     0   :  { %12 = vsyncpa [#allocation3], 0  ;;  %s798_s0 = inlined_call_operand.hbm [shape: f32[8,48], index: 0, kind: input, shape index: {}]   ;;  %s799_s1 = inlined_call_operand.hbm [shape: f32[8,16], index: 1, kind: input, shape index: {}]   ;;  %s800_s2 = inlined_call_operand.hbm [shape: f32[48,128], index: 2, kind: input, shape index: {}]   ;;  %s801_s3 = inlined_call_operand.hbm [shape: f32[16,128], index: 3, kind: input, shape index: {}]   ;;  %s802_s4 = inlined_call_operand.vmem [shape: f32[1,128], index: 4, kind: input, shape index: {}]   ;;  %s803_s5 = inlined_call_operand.hbm [shape: f32[128,128], index: 5, kind: input, shape index: {}]   ;;  %s804_s6 = inlined_call_operand.vmem [shape: f32[1,128], index: 6, kind: input, shape index: {}]   ;;  %s805_s7 = inlined_call_operand.hbm [shape: f32[8,128], index: 7, kind: output, shape index: {}]  }
   0x1   :  { %13 = vsyncpa [#allocation6], 0 }
   0x2   :  { %14 = vsyncpa [#allocation9], 0 }
   0x3   :  { %15 = vsyncpa [#allocation4], 0  ;;  %s645_s24 = smov [#allocation5]   ;;  %s505_s28 = scalar_lea.hbm %s799_s1, 128 }
   0x4   :  { %s32_s25 = sshll.u32 %s645_s24, 4  ;;  %p506_p0 = scmp.ne.s32.totalorder %s799_s1, %s505_s28  ;;  %s33_s25 = int_to_ptr.vmem [resolvable:$true] %s32_s25 }
   0x5   :  { %p509_p1 = scmp.lt.u32.totalorder %s505_s28, %s799_s1 }
   0x7   :  { %p511_p2 = pnand %p509_p1, %p506_p0 }
   0x9   :  { %514 = shalt.err (!%p511_p2)
}
   0xa   :  { %s515_s10 = scalar_lea.vmem %s33_s25, 128  ;;  %p520_p4 = scmp.lt.s32.totalorder %s33_s25, %s33_s25 }
   0xb   :  { %p516_p3 = scmp.ne.s32.totalorder %s33_s25, %s515_s10  ;;  %p521_p5 = scmp.lt.s32.totalorder %s515_s10, %s515_s10 }
   0xd   :  { %p522_p6 = por %p521_p5, %p520_p4 }
   0xf   :  { %p523_p7 = pnand %p522_p6, %p516_p3 }
  0x11   :  { %526 = shalt.err (!%p523_p7)
}
  0x12   :  { %35 = dma.hbm_to_vmem [thread:$0]  %s799_s1, 128, %s33_s25, [#allocation6]  }
  0x13   :  { %s646_s13 = smov [#allocation8]   ;;  %s647_s15 = smov [#allocation2]  }
  0x14   :  { %s53_s14 = sshll.u32 %s646_s13, 4  ;;  %s22_s16 = sshll.u32 %s647_s15, 4  ;;  %s54_s14 = int_to_ptr.vmem [resolvable:$true] %s53_s14  ;;  %s23_s16 = int_to_ptr.vmem [resolvable:$true] %s22_s16 }
  0x15   :  { %s527_s19 = scalar_lea.hbm %s801_s3, 256 }
  0x16   :  { %p528_p8 = scmp.ne.s32.totalorder %s801_s3, %s527_s19  ;;  %p531_p9 = scmp.lt.u32.totalorder %s527_s19, %s801_s3 }
  0x18   :  { %p533_p10 = pnand %p531_p9, %p528_p8 }
  0x1a   :  { %536 = shalt.err (!%p533_p10)
}
  0x1b   :  { %s537_s1 = scalar_lea.vmem %s54_s14, 256  ;;  %p542_p12 = scmp.lt.s32.totalorder %s54_s14, %s54_s14 }
  0x1c   :  { %p538_p11 = scmp.ne.s32.totalorder %s54_s14, %s537_s1  ;;  %p543_p13 = scmp.lt.s32.totalorder %s537_s1, %s537_s1 }
  0x1e   :  { %p544_p0 = por %p543_p13, %p542_p12 }
  0x20   :  { %p545_p1 = pnand %p544_p0, %p538_p11 }
  0x22   :  { %548 = shalt.err (!%p545_p1)
}
  0x23   :  { %s648_s24 = smov 128   ;;  %s649_s25 = smov 8  }
  0x24   :  { %59 = dma.hbm_to_vmem [thread:$0]  %s801_s3, 256, %s54_s14, [#allocation9], %s648_s24, %s648_s24, %s649_s25  }
  0x25   :  { %s549_s30 = scalar_lea.hbm %s798_s0, 128 }
  0x26   :  { %p550_p2 = scmp.ne.s32.totalorder %s798_s0, %s549_s30  ;;  %p553_p3 = scmp.lt.u32.totalorder %s549_s30, %s798_s0 }
  0x28   :  { %p555_p4 = pnand %p553_p3, %p550_p2 }
  0x2a   :  { %558 = shalt.err (!%p555_p4)
}
  0x2b   :  { %s559_s12 = scalar_lea.vmem %s23_s16, 128  ;;  %p564_p6 = scmp.lt.s32.totalorder %s23_s16, %s23_s16 }
  0x2c   :  { %p560_p5 = scmp.ne.s32.totalorder %s23_s16, %s559_s12  ;;  %p565_p7 = scmp.lt.s32.totalorder %s559_s12, %s559_s12 }
  0x2e   :  { %p566_p8 = por %p565_p7, %p564_p6 }
  0x30   :  { %p567_p9 = pnand %p566_p8, %p560_p5 }
  0x32   :  { %570 = shalt.err (!%p567_p9)
}
  0x33   :  { %25 = dma.hbm_to_vmem [thread:$0]  %s798_s0, 128, %s23_s16, [#allocation3]  }
  0x34   :  { %s650_s14 = smov [#allocation7]   ;;  %s651_s17 = smov [#allocation10]  }
  0x35   :  { %s41_s15 = sshll.u32 %s650_s14, 4  ;;  %s67_s18 = sshll.u32 %s651_s17, 4  ;;  %s42_s15 = int_to_ptr.vmem [resolvable:$true] %s41_s15  ;;  %s68_s18 = int_to_ptr.vmem [resolvable:$true] %s67_s18 }
  0x36   :  { %s571_s21 = scalar_lea.hbm %s800_s2, 768 }
  0x37   :  { %p572_p10 = scmp.ne.s32.totalorder %s800_s2, %s571_s21  ;;  %p575_p11 = scmp.lt.u32.totalorder %s571_s21, %s800_s2 }
  0x39   :  { %p577_p12 = pnand %p575_p11, %p572_p10 }
  0x3b   :  { %580 = shalt.err (!%p577_p12)
}
  0x3c   :  { %s581_s0 = scalar_lea.vmem %s42_s15, 768  ;;  %p586_p0 = scmp.lt.s32.totalorder %s42_s15, %s42_s15 }
  0x3d   :  { %p582_p13 = scmp.ne.s32.totalorder %s42_s15, %s581_s0  ;;  %p587_p1 = scmp.lt.s32.totalorder %s581_s0, %s581_s0 }
  0x3f   :  { %p588_p2 = por %p587_p1, %p586_p0 }
  0x41   :  { %p589_p3 = pnand %p588_p2, %p582_p13 }
  0x43   :  { %592 = shalt.err (!%p589_p3)
}
  0x44   :  { %47 = dma.hbm_to_vmem [thread:$0]  %s800_s2, 768, %s42_s15, [#allocation6], %s648_s24, %s648_s24, %s649_s25  }
  0x45   :  { %s593_s30 = scalar_lea.hbm %s803_s5, 2048 }
  0x46   :  { %p594_p4 = scmp.ne.s32.totalorder %s803_s5, %s593_s30  ;;  %p597_p5 = scmp.lt.u32.totalorder %s593_s30, %s803_s5 }
  0x48   :  { %p599_p6 = pnand %p597_p5, %p594_p4 }
  0x4a   :  { %602 = shalt.err (!%p599_p6)
}
  0x4b   :  { %s603_s12 = scalar_lea.vmem %s68_s18, 2048  ;;  %p608_p8 = scmp.lt.s32.totalorder %s68_s18, %s68_s18 }
  0x4c   :  { %p604_p7 = scmp.ne.s32.totalorder %s68_s18, %s603_s12  ;;  %p609_p9 = scmp.lt.s32.totalorder %s603_s12, %s603_s12 }
  0x4e   :  { %p610_p10 = por %p609_p9, %p608_p8 }
  0x50   :  { %p611_p11 = pnand %p610_p10, %p604_p7 }
  0x52   :  { %614 = shalt.err (!%p611_p11)
}
  0x53   :  { %73 = dma.hbm_to_vmem [thread:$0]  %s803_s5, 2048, %s68_s18, [#allocation9], %s648_s24, %s648_s24, %s649_s25  }
  0x54   :  { %637 = dma.done.wait [#allocation3], 128  }
  0x55   :  { %638 = vsyncadd [#allocation3], 4294967168 }
  0x56   :  { %639 = dma.done.wait [#allocation6], 896  }
  0x57   :  { %640 = vsyncadd [#allocation6], 4294966400 }
  0x58   :  { %641 = dma.done.wait [#allocation9], 2304  }
  0x59   :  { %642 = vsyncadd [#allocation9], 4294964992  ;;  %v652_v0 = vmov 0.0|0.0   ;;  %vm653_vm0 = vmmov 0   ;;  %v654_v1 = vmov 0.0   ;;  %v99_v2 = vld [vmem:[#allocation8] sm:$0xff] }
  0x5a   :  { %458 = vmatprep.subr.bf16.mxu1 %v652_v0  ;;  %405 = vmatprep.mubr.msk.f32.mxu1 %vm653_vm0, %v654_v1  ;;  %v100_v3 = vld [vmem:[#allocation8 + $0x8] sm:$0xff]  ;;  %v92_v5 = vld [vmem:[#allocation7] sm:$0xff]  ;;  %v93_v6 = vld [vmem:[#allocation7 + $0x8] sm:$0xff]  ;;  %vm101_vm1 = vcmask 130048   ;;  %vm175_vm2 = vcmask 392192   ;;  %s655_s14 = smov [#allocation11]  }
  0x5b   :  { %470 = vmatprep.subr.bf16.mxu0 %v652_v0  ;;  %455 = vmatprep.mubr.msk.f32.mxu0 %vm653_vm0, %v654_v1  ;;  %v459_v4 = vpack.c.bf16 %v100_v3, %v99_v2  ;;  %v98_v7 = vld [vmem:[#allocation5] sm:$0xff]  ;;  %v462_v8 = vpack.c.bf16 %v93_v6, %v92_v5  ;;  %v94_v9 = vld [vmem:[#allocation7 + $0x10] sm:$0xff]  ;;  %v258_v10 = vld [vmem:[#allocation10] sm:$0xff]  ;;  %s359_s15 = sshll.u32 %s655_s14, 4  ;;  %s360_s15 = int_to_ptr.vmem [resolvable:$true] %s359_s15 }
  0x5c   :  { %v259_v11 = vld [vmem:[#allocation10 + $0x8] sm:$0xff]  ;;  %v95_v12 = vld [vmem:[#allocation7 + $0x18] sm:$0xff]  ;;  %v260_v14 = vld [vmem:[#allocation10 + $0x10] sm:$0xff]  ;;  %s615_s17 = scalar_lea.vmem %s360_s15, 128  ;;  %p620_p13 = scmp.lt.s32.totalorder %s360_s15, %s360_s15 }
  0x5d   :  { %460 = vmatpush3.bf16.msra.mxu1 %v459_v4  ;;  %v471_v13 = vpack.c.bf16 %v259_v11, %v258_v10  ;;  %v261_v15 = vld [vmem:[#allocation10 + $0x18] sm:$0xff]  ;;  %v465_v17 = vpack.c.bf16 %v95_v12, %v94_v9  ;;  %v262_v18 = vld [vmem:[#allocation10 + $0x20] sm:$0xff]  ;;  %v263_v19 = vld [vmem:[#allocation10 + $0x28] sm:$0xff]  ;;  %p616_p12 = scmp.ne.s32.totalorder %s360_s15, %s615_s17  ;;  %p621_p0 = scmp.lt.s32.totalorder %s615_s17, %s615_s17 }
  0x5e   :  { %461 = vmatprep.subr.bf16.mxu1 %v652_v0  ;;  %v474_v16 = vpack.c.bf16 %v261_v15, %v260_v14  ;;  %v96_v20 = vld [vmem:[#allocation7 + $0x20] sm:$0xff]  ;;  %v97_v21 = vld [vmem:[#allocation7 + $0x28] sm:$0xff]  ;;  %v477_v22 = vpack.c.bf16 %v263_v19, %v262_v18  ;;  %v91_v24 = vld [vmem:[#allocation2] sm:$0xff] }
  0x5f   :  { %472 = vmatpush3.bf16.msra.mxu0 %v471_v13  ;;  %v468_v23 = vpack.c.bf16 %v97_v21, %v96_v20  ;;  %v264_v25 = vld [vmem:[#allocation10 + $0x30] sm:$0xff]  ;;  %v265_v26 = vld [vmem:[#allocation10 + $0x38] sm:$0xff]  ;;  %v266_v28 = vld [vmem:[#allocation10 + $0x40] sm:$0xff]  ;;  %p622_p1 = por %p621_p0, %p620_p13 }
  0x60   :  { %406 = vmatmul.mubr.msk.f32.vlgmr.msra.gmra.mrb[0].mxu1 %vm101_vm1, %v98_v7  ;;  %473 = vmatprep.subr.bf16.mxu0 %v652_v0  ;;  %v480_v27 = vpack.c.bf16 %v265_v26, %v264_v25  ;;  %v267_v29 = vld [vmem:[#allocation10 + $0x48] sm:$0xff]  ;;  %v268_v30 = vld [vmem:[#allocation10 + $0x50] sm:$0xff]  ;;  %v269_v32 = vld [vmem:[#allocation10 + $0x58] sm:$0xff] }
  0x61   :  { %463 = vmatpush3.bf16.msra.mxu1 %v462_v8  ;;  %420 = vmatprep.mubr.msk.f32.mxu1 %vm653_vm0, %v654_v1  ;;  %v483_v31 = vpack.c.bf16 %v267_v29, %v266_v28  ;;  %v486_v33 = vpack.c.bf16 %v269_v32, %v268_v30  ;;  %v270_v34 = vld [vmem:[#allocation10 + $0x60] sm:$0xff]  ;;  %v271_v35 = vld [vmem:[#allocation10 + $0x68] sm:$0xff]  ;;  %v272_v37 = vld [vmem:[#allocation10 + $0x70] sm:$0xff]  ;;  %p623_p2 = pnand %p622_p1, %p616_p12 }
  0x62   :  { %464 = vmatprep.subr.bf16.mxu1 %v652_v0  ;;  %v489_v36 = vpack.c.bf16 %v271_v35, %v270_v34  ;;  %v273_v38 = vld [vmem:[#allocation10 + $0x78] sm:$0xff]  ;;  %v372_v43 = vld [vmem:[%s802_s4] ss:$0 sm:$0xff] }
  0x63   :  { %475 = vmatpush3.bf16.msra.mxu0 %v474_v16  ;;  %v492_v39 = vpack.c.bf16 %v273_v38, %v272_v37  ;;  %v373_v48 = vld [vmem:[%s804_s6] ss:$0 sm:$0xff] }
  0x64   :  { %476 = vmatprep.subr.bf16.mxu0 %v652_v0 }
  0x65   :  { %466 = vmatpush3.bf16.msra.mxu1 %v465_v17 }
  0x66   :  { %467 = vmatprep.subr.bf16.mxu1 %v652_v0 }
  0x67   :  { %478 = vmatpush3.bf16.msra.mxu0 %v477_v22 }
  0x68   :  { %479 = vmatprep.subr.bf16.mxu0 %v652_v0 }
  0x69   :  { %469 = vmatpush3.bf16.msra.mxu1 %v468_v23 }
  0x6b   :  { %481 = vmatpush3.bf16.msra.mxu0 %v480_v27 }
  0x6c   :  { %421 = vmatmul.mubr.msk.f32.vlgmr.msra.gmra.mrb[2].mxu1 %vm175_vm2, %v91_v24  ;;  %482 = vmatprep.subr.bf16.mxu0 %v652_v0 }
  0x6f   :  { %484 = vmatpush3.bf16.msra.mxu0 %v483_v31 }
  0x70   :  { %485 = vmatprep.subr.bf16.mxu0 %v652_v0 }
  0x73   :  { %487 = vmatpush3.bf16.msra.mxu0 %v486_v33 }
  0x74   :  { %488 = vmatprep.subr.bf16.mxu0 %v652_v0 }
  0x77   :  { %490 = vmatpush3.bf16.msra.mxu0 %v489_v36 }
  0x78   :  { %491 = vmatprep.subr.bf16.mxu0 %v652_v0 }
  0x7b   :  { %493 = vmatpush3.bf16.msra.mxu0 %v492_v39 }
 0x133   :  { %v171_v40 = vpop.f32.mrb[0].mxu1 }
 0x134   :  { %v407_v41 = vpop.f32.mrb[1].mxu1 }
 0x13f   :  { %v245_v42 = vpop.f32.mrb[2].mxu1 }
 0x140   :  { %v246_v44 = vadd.f32 %v245_v42, %v171_v40  ;;  %v422_v45 = vpop.f32.mrb[3].mxu1 }
 0x142   :  { %v256_v46 = vadd.f32 %v372_v43, %v246_v44 }
 0x144   :  { %v257_v47 = vmax.f32 %v256_v46, 0.0 }
 0x146   :  { %456 = vmatmul.mubr.f32.vlgmr.msra.gmra.mrb[0].mxu0 %v257_v47 }
 0x219   :  { %v347_v49 = vpop.f32.mrb[0].mxu0 }
 0x21a   :  { %v348_v50 = vadd.f32 %v373_v48, %v347_v49  ;;  %v457_v51 = vpop.f32.mrb[1].mxu0 }
 0x21c   :  { %v351_v52 = vmax.f32 %v348_v50, 0.0 }
 0x21e   :  { %352 = vst [vmem:[#allocation11] sm:$0xff] %v351_v52 }
 0x21f   :  { %626 = shalt.err (!%p623_p2)
}
 0x220   :  { %s627_s19 = scalar_lea.hbm %s805_s7, 128 }
 0x221   :  { %p628_p3 = scmp.ne.s32.totalorder %s805_s7, %s627_s19  ;;  %p631_p4 = scmp.lt.u32.totalorder %s627_s19, %s805_s7 }
 0x223   :  { %p633_p5 = pnand %p631_p4, %p628_p3 }
 0x225   :  { %636 = shalt.err (!%p633_p5)
}
 0x226   :  { %362 = dma.vmem_to_hbm [thread:$0]  %s360_s15, 128, %s805_s7, [#allocation4]  }
 0x227   :  { %643 = dma.done.wait [#allocation4], 128  }
 0x228   :  { %644 = vsyncadd [#allocation4], 4294967168 }
 0x229   :  { %366 = vsyncpa [#allocation3], 1 }
 0x22a   :  { %367 = vsyncpa [#allocation6], 1 }
 0x22b   :  { %368 = vsyncpa [#allocation9], 1 }
 0x22c   :  { %369 = vsyncpa [#allocation4], 1 }

</bundles_post_ra>
